<compile_context>
chip_gen: v7x
topology: tpu7x:2x2x1
jax: 0.10.0
libtpu: 0.0.40
codegen_flags: <defaults>
</compile_context>

<pallas_src>
import jax
import jax.numpy as jnp
from jax.experimental import pallas as pl
from jax.experimental.pallas import tpu as pltpu

_MIB = 1024 * 1024


# --------------------------------------------------------------------------- #
# helpers
# --------------------------------------------------------------------------- #
def _round_up(x, m):
    return -(-x // m) * m


def _vmem_budget_and_limit():
    """Generation-aware VMEM working-set budget + compiler limit (bytes)."""
    try:
        cap = int(pltpu.get_tpu_info().vmem_capacity_bytes)
    except Exception:
        # Unknown part: assume the smallest (v7x-like 64 MiB per core).
        cap = 64 * _MIB
    budget = max(24 * _MIB, int(0.68 * cap))
    limit = max(budget + 4 * _MIB, int(0.82 * cap))
    return budget, limit


def _const_map(grid_rank, ndim):
    """Constant index map (weights resident in VMEM for the whole grid)."""
    if grid_rank == 1:
        return lambda b: (0,) * ndim
    return lambda b, t: (0,) * ndim


def _blockspec(shape, index_map, buffers=None):
    """BlockSpec, optionally with an explicit pipeline buffer count."""
    if buffers is None:
        return pl.BlockSpec(shape, index_map)
    return pl.BlockSpec(shape, index_map, pipeline_mode=pl.Buffered(int(buffers)))


def _choose_batch_tile(B, tb_budget):
    """Pick (TB, padded_B): big tiles, >=2 grid steps when possible, no pad if
    a divisor of B is close to the budget-derived tile."""
    tb_budget = max(1, int(tb_budget))
    if B <= tb_budget and B < 16:
        return B, B                                   # tiny batch, one step
    tb8 = max(8, (min(tb_budget, B) // 8) * 8)
    # Cap so the grid has >= 2 steps (lets v7x use both TensorCores).
    cap = _round_up(-(-B // 2), 8) if B >= 16 else tb8
    divs = [d for d in range(8, tb8 + 1, 8) if B % d == 0]
    divs_capped = [d for d in divs if d <= cap]
    if divs_capped and divs_capped[-1] >= max(8, min(tb8, cap) // 2):
        return divs_capped[-1], B                     # no pad, >=2 steps
    if divs and divs[-1] >= tb8 // 2:
        return divs[-1], B                            # no pad
    if B <= tb_budget:
        return B, B                                   # whole batch, no pad
    tb = min(tb8, cap)
    return tb, _round_up(B, tb)                       # pad (rare: awkward B)


# --------------------------------------------------------------------------- #
# kernels
# --------------------------------------------------------------------------- #
def _make_batch_tiled_kernel(num_layers: int, n_nodes: int):
    """Grid = (batch tiles,).  Whole node/feature axes resident per step."""
    inv_n = 1.0 / float(n_nodes)

    def kernel(x_ref, wpool_ref, *rest):
        out_ref = rest[-1]
        wb = rest[:-1]

        x3 = x_ref[...]                                        # [TB, Np, F]
        tb, n, f = x3.shape
        rows = tb * n

        # Pooled path (once per batch row): mean over nodes -> Linear -> relu.
        pooled = jnp.sum(x3.astype(jnp.float32), axis=1) * inv_n          # [TB, F]
        h_pooled = jnp.dot(pooled, wpool_ref[...].astype(jnp.float32),
                           preferred_element_type=jnp.float32)            # [TB, F]
        hp = jnp.maximum(h_pooled, 0.0)

        # relu(cat([f_pooled, f_local])) == (relu(f_pooled), relu(f_local)),
        # so the lane-axis concat is replaced by two half-width contractions.
        xr = jnp.maximum(x3, 0.0)                                          # [TB, Np, F]

        if num_layers == 1:
            wrow_p = wb[0][...]                                 # [1, F] f32
            wrow_l = wb[1][...]                                 # [1, F] f32
            b_last = wb[2][...]                                 # [1, 1] f32
            pool_c = jnp.sum(hp * wrow_p, axis=-1, keepdims=True)          # [TB, 1]
            loc_c = jnp.sum(xr.astype(jnp.float32) * wrow_l, axis=-1)      # [TB, Np]
            out_ref[...] = (loc_c + pool_c + b_last).astype(out_ref.dtype)
            return

        w0p = wb[0][...]                                        # [F, H0]
        w0l = wb[1][...]                                        # [F, H0]
        b0 = wb[2][...]                                         # [1, H0] f32
        pool_c = jnp.dot(hp, w0p.astype(jnp.float32),
                         preferred_element_type=jnp.float32)               # [TB, H0]
        loc_c = jnp.dot(xr.reshape(rows, f), w0l,
                        preferred_element_type=jnp.float32)                # [rows, H0]
        feats = jnp.maximum(loc_c.reshape(tb, n, -1) + pool_c[:, None, :] + b0,
                            0.0).reshape(rows, -1)

        idx = 3
        for _ in range(num_layers - 2):
            w = wb[idx][...]
            b = wb[idx + 1][...]
            idx += 2
            feats = jnp.maximum(
                jnp.dot(feats, w, preferred_element_type=jnp.float32) + b, 0.0)

        # Final H -> 1 layer: VPU multiply + lane reduce (no 1-column matmul).
        wrow = wb[idx][...]                                     # [1, H]  f32
        b_last = wb[idx + 1][...]                               # [1, 1]  f32
        out2 = jnp.sum(feats.reshape(tb, n, -1) * wrow, axis=-1) + b_last
        out_ref[...] = out2.astype(out_ref.dtype)               # [TB, Np]

    return kernel


def _make_node_tiled_kernel(num_layers: int):
    """Grid = (batch, node tiles).  Pooled contribution precomputed wrapper-side
    (includes layer-0 bias), so the kernel only runs the local path."""

    def kernel(x_ref, poolc_ref, *rest):
        out_ref = rest[-1]
        wb = rest[:-1]

        x3 = x_ref[...]                                         # [1, TN, F]
        _, tn, f = x3.shape
        xr = jnp.maximum(x3, 0.0).reshape(tn, f)
        pool_c = poolc_ref[...].reshape(1, -1)                  # [1, H0] (+bias0)

        if num_layers == 1:
            wrow_l = wb[0][...]                                 # [1, F] f32
            out = jnp.sum(xr.astype(jnp.float32) * wrow_l,
                          axis=-1, keepdims=True) + pool_c                 # [TN, 1]
        else:
            w0l = wb[0][...]                                    # [F, H0]
            loc = jnp.dot(xr, w0l, preferred_element_type=jnp.float32)     # [TN, H0]
            feats = jnp.maximum(loc + pool_c, 0.0)
            idx = 1
            for _ in range(num_layers - 2):
                w = wb[idx][...]
                b = wb[idx + 1][...]
                idx += 2
                feats = jnp.maximum(
                    jnp.dot(feats, w, preferred_element_type=jnp.float32) + b, 0.0)
            wrow = wb[idx][...]
            b_last = wb[idx + 1][...]
            out = jnp.sum(feats * wrow, axis=-1, keepdims=True) + b_last   # [TN, 1]

        out_ref[...] = out.reshape(out_ref.shape).astype(out_ref.dtype)

    return kernel


# --------------------------------------------------------------------------- #
# wrapper
# --------------------------------------------------------------------------- #
def readout_layer_forward(x, w_pool, readout_ws, readout_bs, *,
                          compute_dtype=None,
                          x_buffer_count=2,
                          vmem_budget_bytes=None,
                          force_node_tiled=False,
                          node_tile=None):
    """Pallas implementation of ReadoutLayer.forward.

    x:          [B, N, F]
    w_pool:     [F, F]   (torch layer_pooled.weight.T, no bias)
    readout_ws: list of [n_in, n_out]  (torch weight.T)
    readout_bs: list of [n_out] or [1, n_out]
    compute_dtype: e.g. jnp.bfloat16 to halve HBM read traffic of x / weights.
    returns:    [B, N, 1] in x.dtype
    """
    B, N, F = x.shape
    L = len(readout_ws)
    assert L >= 1
    out_dtype = x.dtype

    param_dtype = jnp.dtype(compute_dtype) if compute_dtype is not None else x.dtype
    xi = jnp.dtype(param_dtype).itemsize
    x = x.astype(param_dtype)           # no-op when already param_dtype

    # ---- weight / bias preparation (biases + 1-row weights stay f32) --------
    w_pool_c = jnp.asarray(w_pool, param_dtype)
    biases = [jnp.asarray(b, jnp.float32).reshape(1, -1) for b in readout_bs]
    w0 = readout_ws[0]
    if L == 1:
        w0_pool = jnp.asarray(w0[:F].T, jnp.float32)            # [1, F]
        w0_local = jnp.asarray(w0[F:].T, jnp.float32)           # [1, F]
        b_last = biases[0].reshape(1, 1)
        main_wb = [w0_pool, w0_local, b_last]
        fb_wb = [w0_local]
    else:
        w0_pool = jnp.asarray(w0[:F], param_dtype)              # [F, H0]
        w0_local = jnp.asarray(w0[F:], param_dtype)             # [F, H0]
        mids = []
        for w, b in zip(readout_ws[1:-1], biases[1:-1]):
            mids += [jnp.asarray(w, jnp.float32), b]
        w_last = jnp.asarray(readout_ws[-1].T, jnp.float32)     # [1, H]
        b_last = biases[-1].reshape(1, 1)
        main_wb = [w0_pool, w0_local, biases[0]] + mids + [w_last, b_last]
        fb_wb = [w0_local] + mids + [w_last, b_last]

    hmax = max([F] + [int(w.shape[1]) for w in readout_ws])
    out_itemsize = jnp.dtype(out_dtype).itemsize

    # Node padding keeps the in-kernel (TB,N,F)<->(TB*N,F) reshapes free.
    npad = _round_up(N, 8)

    budget, vmem_limit = _vmem_budget_and_limit()
    if vmem_budget_bytes is not None:
        budget = int(vmem_budget_bytes)

    weight_bytes = sum(int(a.size) * a.dtype.itemsize for a in [w_pool_c] + main_wb)

    # Conservative per-batch-row VMEM footprint: pipelined x buffers, one
    # relu'd + one f32 working copy of x, ~4 f32 copies of the widest
    # activation, and the double-buffered output block.
    per_row = npad * (x_buffer_count * F * xi
                      + F * (xi + 4)
                      + 4 * 4 * hmax
                      + 2 * out_itemsize)
    avail = budget - 2 * weight_bytes - 2 * _MIB
    tb_raw = max(0, avail) // max(1, per_row)

    use_node_tiled = force_node_tiled or tb_raw < min(8, B)

    # =========================== main (batch-tiled) path ======================
    if not use_node_tiled:
        TB, Bp = _choose_batch_tile(B, tb_raw)
        pad_b, pad_n = Bp - B, npad - N
        xp = x if (pad_b == 0 and pad_n == 0) else jnp.pad(
            x, ((0, pad_b), (0, pad_n), (0, 0)))
        grid = (Bp // TB,)
        kernel = _make_batch_tiled_kernel(L, N)
        args = [xp, w_pool_c] + main_wb

        def launch(use_pipeline_mode):
            xbuf = (x_buffer_count
                    if (use_pipeline_mode and x_buffer_count != 2) else None)
            wbuf = 1 if use_pipeline_mode else None
            in_specs = [_blockspec((TB, npad, F), lambda b: (b, 0, 0), buffers=xbuf)]
            for a in [w_pool_c] + main_wb:
                in_specs.append(_blockspec(a.shape, _const_map(1, a.ndim),
                                           buffers=wbuf))
            return pl.pallas_call(
                kernel,
                out_shape=jax.ShapeDtypeStruct((Bp, npad), out_dtype),
                grid=grid,
                in_specs=in_specs,
                out_specs=pl.BlockSpec((TB, npad), lambda b: (b, 0)),
                compiler_params=pltpu.CompilerParams(
                    dimension_semantics=("parallel",),
                    vmem_limit_bytes=int(vmem_limit)),
            )(*args)

        try:
            out2d = launch(True)           # single-buffered resident weights
        except Exception:                  # pl.Buffered unsupported -> default
            out2d = launch(False)
        return out2d[:B, :N].reshape(B, N, 1)

    # ========================= node-tiled fallback path =======================
    # The pooled term needs the whole node axis, so when a full batch row does
    # not fit the VMEM budget it is computed wrapper-side (one extra pass over
    # x, fallback-only) and the kernel tiles the node axis.
    pooled = jnp.sum(x, axis=1, dtype=jnp.float32) * (1.0 / N)             # [B, F]
    hp = jax.nn.relu(jnp.dot(pooled, w_pool_c.astype(jnp.float32)))
    pool_c = jnp.dot(hp, jnp.asarray(readout_ws[0][:F], jnp.float32)) + biases[0]
    pool_c3 = pool_c.reshape(B, 1, -1)                                     # [B,1,H0c]

    per_node = (x_buffer_count * F * xi + F * (xi + 4) + 4 * 4 * hmax
                + 2 * out_itemsize)
    if node_tile is not None:
        TN = max(8, (int(node_tile) // 8) * 8)
    else:
        avail = budget - 2 * weight_bytes - 2 * _MIB
        TN = max(8, (max(0, avail) // max(1, per_node)) // 8 * 8)
    TN = min(TN, _round_up(N, 8))
    npad2 = _round_up(N, TN)
    gt = npad2 // TN
    xp = x if npad2 == N else jnp.pad(x, ((0, 0), (0, npad2 - N), (0, 0)))
    kernel = _make_node_tiled_kernel(L)
    args = [xp, pool_c3] + fb_wb

    def launch(use_pipeline_mode):
        xbuf = (x_buffer_count
                if (use_pipeline_mode and x_buffer_count != 2) else None)
        wbuf = 1 if use_pipeline_mode else None
        in_specs = [
            _blockspec((1, TN, F), lambda b, t: (b, t, 0), buffers=xbuf),
            _blockspec((1, 1, pool_c3.shape[-1]), lambda b, t: (b, 0, 0)),
        ]
        for a in fb_wb:
            in_specs.append(_blockspec(a.shape, _const_map(2, a.ndim), buffers=wbuf))
        return pl.pallas_call(
            kernel,
            out_shape=jax.ShapeDtypeStruct((B, gt, 1, TN), out_dtype),
            grid=(B, gt),
            in_specs=in_specs,
            out_specs=pl.BlockSpec((1, 1, 1, TN), lambda b, t: (b, t, 0, 0)),
            compiler_params=pltpu.CompilerParams(
                dimension_semantics=("parallel", "parallel"),
                vmem_limit_bytes=int(vmem_limit)),
        )(*args)

    try:
        out4d = launch(True)
    except Exception:
        out4d = launch(False)
    return out4d.reshape(B, npad2)[:, :N].reshape(B, N, 1)


# --------------------------------------------------------------------------- #
# reference + tests
# --------------------------------------------------------------------------- #
def readout_layer_reference(x, w_pool, readout_ws, readout_bs):
    """Pure-JAX reference mirroring the PyTorch forward exactly (f32)."""
    B, N, F = x.shape
    h_pooled = (x.sum(axis=1) / N) @ w_pool
    f_pooled = jnp.broadcast_to(h_pooled[:, None, :], x.shape)
    feats = jax.nn.relu(jnp.concatenate([f_pooled, x], axis=-1))
    for i, (w, b) in enumerate(zip(readout_ws, readout_bs)):
        feats = feats @ w + b
        if i < len(readout_ws) - 1:
            feats = jax.nn.relu(feats)
    return feats


def _make_params(key, B, N, F, n_hid):
    dims = [2 * F] + list(n_hid) + [1]
    n_w = len(dims) - 1
    keys = jax.random.split(key, 2 + 2 * n_w)
    x = jax.random.normal(keys[0], (B, N, F), dtype=jnp.float32)
    w_pool = (jax.random.normal(keys[1], (F, F), dtype=jnp.float32)
              / jnp.sqrt(jnp.float32(F)))
    ws, bs = [], []
    for i, (n_in, n_out) in enumerate(zip(dims, dims[1:])):
        ws.append(jax.random.normal(keys[2 + 2 * i], (n_in, n_out), jnp.float32)
                  / jnp.sqrt(jnp.float32(n_in)))
        bs.append(0.1 * jax.random.normal(keys[3 + 2 * i], (1, n_out), jnp.float32))
    return x, w_pool, ws, bs


def _check(name, out, ref, atol, rtol):
    out = jax.block_until_ready(out)
    assert out.shape == ref.shape, (name, out.shape, ref.shape)
    out32 = out.astype(jnp.float32)
    err = float(jnp.max(jnp.abs(out32 - ref)))
    assert jnp.allclose(out32, ref, atol=atol, rtol=rtol), (name, err)


if __name__ == "__main__":
    key = jax.random.PRNGKey(0)
    k1, k2, k3, k4 = jax.random.split(key, 4)

    # 1) module defaults at small shapes: B=2, N=16, F=32, n_hid=[16]
    x, wp, ws, bs = _make_params(k1, 2, 16, 32, [16])
    ref = readout_layer_reference(x, wp, ws, bs)
    _check("small_f32", readout_layer_forward(x, wp, ws, bs), ref, 1e-4, 1e-4)

    # 2) single readout layer (n_hid=[]) and a deeper stack (n_hid=[16, 8])
    x, wp, ws, bs = _make_params(k2, 2, 16, 32, [])
    ref = readout_layer_reference(x, wp, ws, bs)
    _check("single_layer", readout_layer_forward(x, wp, ws, bs), ref, 1e-4, 1e-4)

    x, wp, ws, bs = _make_params(k2, 2, 16, 32, [16, 8])
    ref = readout_layer_reference(x, wp, ws, bs)
    _check("deep_f32", readout_layer_forward(x, wp, ws, bs), ref, 1e-4, 1e-4)

    # 3) multi-step grid (2 batch tiles) in f32 and bf16 compute
    x, wp, ws, bs = _make_params(k3, 64, 64, 32, [16])
    ref = readout_layer_reference(x, wp, ws, bs)
    _check("tiled_f32", readout_layer_forward(x, wp, ws, bs), ref, 1e-4, 1e-4)
    # bf16 tolerance is a quantization tolerance (inputs/weights rounded to
    # bf16; accumulation stays f32) - still catches tiling/indexing bugs.
    _check("tiled_bf16",
           readout_layer_forward(x, wp, ws, bs, compute_dtype=jnp.bfloat16),
           ref, 1e-1, 1e-1)

    # 4) node-tiled fallback path (forced) with a node count needing padding
    x, wp, ws, bs = _make_params(k4, 4, 20, 32, [16])
    ref = readout_layer_reference(x, wp, ws, bs)
    _check("node_tiled",
           readout_layer_forward(x, wp, ws, bs,
                                 force_node_tiled=True, node_tile=8),
           ref, 1e-4, 1e-4)

    print("KERNEL_OK")
</pallas_src>

<mosaic_0001>
module attributes {stable_mosaic.version = 11 : i64} {
  func.func @kernel(%arg0: i32, %arg1: memref<2x16x32xf32, #tpu.memory_space<vmem>>, %arg2: memref<32x32xf32, #tpu.memory_space<vmem>>, %arg3: memref<32x16xf32, #tpu.memory_space<vmem>>, %arg4: memref<32x16xf32, #tpu.memory_space<vmem>>, %arg5: memref<1x16xf32, #tpu.memory_space<vmem>>, %arg6: memref<1x16xf32, #tpu.memory_space<vmem>>, %arg7: memref<1x1xf32, #tpu.memory_space<vmem>>, %arg8: memref<2x16xf32, #tpu.memory_space<vmem>>) attributes {dimension_semantics = [#tpu.dimension_semantics<parallel>], iteration_bounds = array<i64: 1>, scalar_prefetch = 0 : i64, scratch_operands = 0 : i64, tpu.core_type = #tpu.core_type<tc>, window_params = [{transform_indices = @transform_0, window_bounds = array<i64: 2, 16, 32>}, {pipeline_mode = #tpu.pipeline_mode<synchronous>, transform_indices = @transform_1, window_bounds = array<i64: 32, 32>}, {pipeline_mode = #tpu.pipeline_mode<synchronous>, transform_indices = @transform_2, window_bounds = array<i64: 32, 16>}, {pipeline_mode = #tpu.pipeline_mode<synchronous>, transform_indices = @transform_3, window_bounds = array<i64: 32, 16>}, {pipeline_mode = #tpu.pipeline_mode<synchronous>, transform_indices = @transform_4, window_bounds = array<i64: 1, 16>}, {pipeline_mode = #tpu.pipeline_mode<synchronous>, transform_indices = @transform_5, window_bounds = array<i64: 1, 16>}, {pipeline_mode = #tpu.pipeline_mode<synchronous>, transform_indices = @transform_6, window_bounds = array<i64: 1, 1>}, {transform_indices = @transform_7, window_bounds = array<i64: 2, 16>}]} {
    %c0 = arith.constant 0 : index
    %c0_0 = arith.constant 0 : index
    %c0_1 = arith.constant 0 : index
    %0 = vector.load %arg1[%c0, %c0_0, %c0_1] : memref<2x16x32xf32, #tpu.memory_space<vmem>>, vector<2x16x32xf32>
    %cst = arith.constant dense<0.000000e+00> : vector<2x32xf32>
    %1 = vector.multi_reduction <add>, %0, %cst [1] : vector<2x16x32xf32> to vector<2x32xf32>
    %cst_2 = arith.constant 6.250000e-02 : f32
    %2 = vector.broadcast %cst_2 : f32 to vector<2x32xf32>
    %3 = arith.mulf %1, %2 : vector<2x32xf32>
    %c0_3 = arith.constant 0 : index
    %c0_4 = arith.constant 0 : index
    %4 = vector.load %arg2[%c0_3, %c0_4] : memref<32x32xf32, #tpu.memory_space<vmem>>, vector<32x32xf32>
    %cst_5 = arith.constant dense<0.000000e+00> : vector<2x32xf32>
    %5 = tpu.matmul %3, %4, %cst_5 {dimension_numbers = #tpu.dot_dimension_numbers<[1], [0], [0], [1], [0, 0, 1, 1], [], []>} : vector<2x32xf32>, vector<32x32xf32>, vector<2x32xf32> -> vector<2x32xf32>
    %cst_6 = arith.constant 0.000000e+00 : f32
    %6 = vector.broadcast %cst_6 : f32 to vector<2x32xf32>
    %7 = arith.maximumf %5, %6 : vector<2x32xf32>
    %cst_7 = arith.constant 0.000000e+00 : f32
    %8 = vector.broadcast %cst_7 : f32 to vector<2x16x32xf32>
    %9 = arith.maximumf %0, %8 : vector<2x16x32xf32>
    %c0_8 = arith.constant 0 : index
    %c0_9 = arith.constant 0 : index
    %10 = vector.load %arg3[%c0_8, %c0_9] : memref<32x16xf32, #tpu.memory_space<vmem>>, vector<32x16xf32>
    %c0_10 = arith.constant 0 : index
    %c0_11 = arith.constant 0 : index
    %11 = vector.load %arg4[%c0_10, %c0_11] : memref<32x16xf32, #tpu.memory_space<vmem>>, vector<32x16xf32>
    %c0_12 = arith.constant 0 : index
    %c0_13 = arith.constant 0 : index
    %12 = vector.load %arg5[%c0_12, %c0_13] : memref<1x16xf32, #tpu.memory_space<vmem>>, vector<1x16xf32>
    %cst_14 = arith.constant dense<0.000000e+00> : vector<2x16xf32>
    %13 = tpu.matmul %7, %10, %cst_14 {dimension_numbers = #tpu.dot_dimension_numbers<[1], [0], [0], [1], [0, 0, 1, 1], [], []>} : vector<2x32xf32>, vector<32x16xf32>, vector<2x16xf32> -> vector<2x16xf32>
    %14 = vector.shape_cast %9 : vector<2x16x32xf32> to vector<32x32xf32>
    %cst_15 = arith.constant dense<0.000000e+00> : vector<32x16xf32>
    %15 = tpu.matmul %14, %11, %cst_15 {dimension_numbers = #tpu.dot_dimension_numbers<[1], [0], [0], [1], [0, 0, 1, 1], [], []>} : vector<32x32xf32>, vector<32x16xf32>, vector<32x16xf32> -> vector<32x16xf32>
    %16 = vector.shape_cast %15 : vector<32x16xf32> to vector<2x16x16xf32>
    %17 = vector.shape_cast %13 : vector<2x16xf32> to vector<2x1x16xf32>
    %18 = vector.broadcast %17 : vector<2x1x16xf32> to vector<2x16x16xf32>
    %19 = arith.addf %16, %18 : vector<2x16x16xf32>
    %20 = vector.shape_cast %12 : vector<1x16xf32> to vector<1x1x16xf32>
    %21 = vector.broadcast %20 : vector<1x1x16xf32> to vector<2x16x16xf32>
    %22 = arith.addf %19, %21 : vector<2x16x16xf32>
    %cst_16 = arith.constant 0.000000e+00 : f32
    %23 = vector.broadcast %cst_16 : f32 to vector<2x16x16xf32>
    %24 = arith.maximumf %22, %23 : vector<2x16x16xf32>
    %25 = vector.shape_cast %24 : vector<2x16x16xf32> to vector<32x16xf32>
    %c0_17 = arith.constant 0 : index
    %c0_18 = arith.constant 0 : index
    %26 = vector.load %arg6[%c0_17, %c0_18] : memref<1x16xf32, #tpu.memory_space<vmem>>, vector<1x16xf32>
    %c0_19 = arith.constant 0 : index
    %c0_20 = arith.constant 0 : index
    %27 = vector.load %arg7[%c0_19, %c0_20] : memref<1x1xf32, #tpu.memory_space<vmem>>, vector<1x1xf32>
    %28 = vector.shape_cast %25 : vector<32x16xf32> to vector<2x16x16xf32>
    %29 = vector.shape_cast %26 : vector<1x16xf32> to vector<1x1x16xf32>
    %30 = vector.broadcast %29 : vector<1x1x16xf32> to vector<2x16x16xf32>
    %31 = arith.mulf %28, %30 : vector<2x16x16xf32>
    %cst_21 = arith.constant dense<0.000000e+00> : vector<2x16xf32>
    %32 = vector.multi_reduction <add>, %31, %cst_21 [2] : vector<2x16x16xf32> to vector<2x16xf32>
    %33 = vector.broadcast %27 : vector<1x1xf32> to vector<2x16xf32>
    %34 = arith.addf %32, %33 : vector<2x16xf32>
    %c0_22 = arith.constant 0 : index
    %c0_23 = arith.constant 0 : index
    %35 = vector.load %arg8[%c0_22, %c0_23] : memref<2x16xf32, #tpu.memory_space<vmem>>, vector<2x16xf32>
    tpu.vector_store %arg8[%c0_22, %c0_23], %34 {strides = array<i32>} : memref<2x16xf32, #tpu.memory_space<vmem>>, vector<2x16xf32>,
    return
  }
  func.func @transform_0(%arg0: i32) -> (i32, i32, i32) {
    %c0_i32 = arith.constant 0 : i32
    %c0_i32_0 = arith.constant 0 : i32
    %c0_i32_1 = arith.constant 0 : i32
    return %arg0, %c0_i32, %c0_i32_0 : i32, i32, i32
  }
  func.func @transform_1(%arg0: i32) -> (i32, i32) {
    %c0_i32 = arith.constant 0 : i32
    %c0_i32_0 = arith.constant 0 : i32
    %c0_i32_1 = arith.constant 0 : i32
    return %c0_i32, %c0_i32_0 : i32, i32
  }
  func.func @transform_2(%arg0: i32) -> (i32, i32) {
    %c0_i32 = arith.constant 0 : i32
    %c0_i32_0 = arith.constant 0 : i32
    %c0_i32_1 = arith.constant 0 : i32
    return %c0_i32, %c0_i32_0 : i32, i32
  }
  func.func @transform_3(%arg0: i32) -> (i32, i32) {
    %c0_i32 = arith.constant 0 : i32
    %c0_i32_0 = arith.constant 0 : i32
    %c0_i32_1 = arith.constant 0 : i32
    return %c0_i32, %c0_i32_0 : i32, i32
  }
  func.func @transform_4(%arg0: i32) -> (i32, i32) {
    %c0_i32 = arith.constant 0 : i32
    %c0_i32_0 = arith.constant 0 : i32
    %c0_i32_1 = arith.constant 0 : i32
    return %c0_i32, %c0_i32_0 : i32, i32
  }
  func.func @transform_5(%arg0: i32) -> (i32, i32) {
    %c0_i32 = arith.constant 0 : i32
    %c0_i32_0 = arith.constant 0 : i32
    %c0_i32_1 = arith.constant 0 : i32
    return %c0_i32, %c0_i32_0 : i32, i32
  }
  func.func @transform_6(%arg0: i32) -> (i32, i32) {
    %c0_i32 = arith.constant 0 : i32
    %c0_i32_0 = arith.constant 0 : i32
    %c0_i32_1 = arith.constant 0 : i32
    return %c0_i32, %c0_i32_0 : i32, i32
  }
  func.func @transform_7(%arg0: i32) -> (i32, i32) {
    %c0_i32 = arith.constant 0 : i32
    %c0_i32_0 = arith.constant 0 : i32
    return %arg0, %c0_i32 : i32, i32
  }
}

module attributes {stable_mosaic.version = 11 : i64} {
  func.func @kernel(%arg0: i32, %arg1: memref<2x16x32xf32, #tpu.memory_space<vmem>>, %arg2: memref<32x32xf32, #tpu.memory_space<vmem>>, %arg3: memref<32x16xf32, #tpu.memory_space<vmem>>, %arg4: memref<32x16xf32, #tpu.memory_space<vmem>>, %arg5: memref<1x16xf32, #tpu.memory_space<vmem>>, %arg6: memref<1x16xf32, #tpu.memory_space<vmem>>, %arg7: memref<1x1xf32, #tpu.memory_space<vmem>>, %arg8: memref<2x16xf32, #tpu.memory_space<vmem>>) attributes {dimension_semantics = [#tpu.dimension_semantics<parallel>], iteration_bounds = array<i64: 1>, scalar_prefetch = 0 : i64, scratch_operands = 0 : i64, tpu.core_type = #tpu.core_type<tc>, window_params = [{transform_indices = @transform_0, window_bounds = array<i64: 2, 16, 32>}, {pipeline_mode = #tpu.pipeline_mode<synchronous>, transform_indices = @transform_1, window_bounds = array<i64: 32, 32>}, {pipeline_mode = #tpu.pipeline_mode<synchronous>, transform_indices = @transform_2, window_bounds = array<i64: 32, 16>}, {pipeline_mode = #tpu.pipeline_mode<synchronous>, transform_indices = @transform_3, window_bounds = array<i64: 32, 16>}, {pipeline_mode = #tpu.pipeline_mode<synchronous>, transform_indices = @transform_4, window_bounds = array<i64: 1, 16>}, {pipeline_mode = #tpu.pipeline_mode<synchronous>, transform_indices = @transform_5, window_bounds = array<i64: 1, 16>}, {pipeline_mode = #tpu.pipeline_mode<synchronous>, transform_indices = @transform_6, window_bounds = array<i64: 1, 1>}, {transform_indices = @transform_7, window_bounds = array<i64: 2, 16>}]} {
    %c0 = arith.constant 0 : index
    %c0_0 = arith.constant 0 : index
    %c0_1 = arith.constant 0 : index
    %0 = vector.load %arg1[%c0, %c0_0, %c0_1] : memref<2x16x32xf32, #tpu.memory_space<vmem>>, vector<2x16x32xf32>
    %cst = arith.constant dense<0.000000e+00> : vector<2x32xf32>
    %1 = vector.multi_reduction <add>, %0, %cst [1] : vector<2x16x32xf32> to vector<2x32xf32>
    %cst_2 = arith.constant 6.250000e-02 : f32
    %2 = vector.broadcast %cst_2 : f32 to vector<2x32xf32>
    %3 = arith.mulf %1, %2 : vector<2x32xf32>
    %c0_3 = arith.constant 0 : index
    %c0_4 = arith.constant 0 : index
    %4 = vector.load %arg2[%c0_3, %c0_4] : memref<32x32xf32, #tpu.memory_space<vmem>>, vector<32x32xf32>
    %cst_5 = arith.constant dense<0.000000e+00> : vector<2x32xf32>
    %5 = tpu.matmul %3, %4, %cst_5 {dimension_numbers = #tpu.dot_dimension_numbers<[1], [0], [0], [1], [0, 0, 1, 1], [], []>} : vector<2x32xf32>, vector<32x32xf32>, vector<2x32xf32> -> vector<2x32xf32>
    %cst_6 = arith.constant 0.000000e+00 : f32
    %6 = vector.broadcast %cst_6 : f32 to vector<2x32xf32>
    %7 = arith.maximumf %5, %6 : vector<2x32xf32>
    %cst_7 = arith.constant 0.000000e+00 : f32
    %8 = vector.broadcast %cst_7 : f32 to vector<2x16x32xf32>
    %9 = arith.maximumf %0, %8 : vector<2x16x32xf32>
    %c0_8 = arith.constant 0 : index
    %c0_9 = arith.constant 0 : index
    %10 = vector.load %arg3[%c0_8, %c0_9] : memref<32x16xf32, #tpu.memory_space<vmem>>, vector<32x16xf32>
    %c0_10 = arith.constant 0 : index
    %c0_11 = arith.constant 0 : index
    %11 = vector.load %arg4[%c0_10, %c0_11] : memref<32x16xf32, #tpu.memory_space<vmem>>, vector<32x16xf32>
    %c0_12 = arith.constant 0 : index
    %c0_13 = arith.constant 0 : index
    %12 = vector.load %arg5[%c0_12, %c0_13] : memref<1x16xf32, #tpu.memory_space<vmem>>, vector<1x16xf32>
    %cst_14 = arith.constant dense<0.000000e+00> : vector<2x16xf32>
    %13 = tpu.matmul %7, %10, %cst_14 {dimension_numbers = #tpu.dot_dimension_numbers<[1], [0], [0], [1], [0, 0, 1, 1], [], []>} : vector<2x32xf32>, vector<32x16xf32>, vector<2x16xf32> -> vector<2x16xf32>
    %14 = vector.shape_cast %9 : vector<2x16x32xf32> to vector<32x32xf32>
    %cst_15 = arith.constant dense<0.000000e+00> : vector<32x16xf32>
    %15 = tpu.matmul %14, %11, %cst_15 {dimension_numbers = #tpu.dot_dimension_numbers<[1], [0], [0], [1], [0, 0, 1, 1], [], []>} : vector<32x32xf32>, vector<32x16xf32>, vector<32x16xf32> -> vector<32x16xf32>
    %16 = vector.shape_cast %15 : vector<32x16xf32> to vector<2x16x16xf32>
    %17 = vector.shape_cast %13 : vector<2x16xf32> to vector<2x1x16xf32>
    %18 = vector.broadcast %17 : vector<2x1x16xf32> to vector<2x16x16xf32>
    %19 = arith.addf %16, %18 : vector<2x16x16xf32>
    %20 = vector.shape_cast %12 : vector<1x16xf32> to vector<1x1x16xf32>
    %21 = vector.broadcast %20 : vector<1x1x16xf32> to vector<2x16x16xf32>
    %22 = arith.addf %19, %21 : vector<2x16x16xf32>
    %cst_16 = arith.constant 0.000000e+00 : f32
    %23 = vector.broadcast %cst_16 : f32 to vector<2x16x16xf32>
    %24 = arith.maximumf %22, %23 : vector<2x16x16xf32>
    %25 = vector.shape_cast %24 : vector<2x16x16xf32> to vector<32x16xf32>
    %c0_17 = arith.constant 0 : index
    %c0_18 = arith.constant 0 : index
    %26 = vector.load %arg6[%c0_17, %c0_18] : memref<1x16xf32, #tpu.memory_space<vmem>>, vector<1x16xf32>
    %c0_19 = arith.constant 0 : index
    %c0_20 = arith.constant 0 : index
    %27 = vector.load %arg7[%c0_19, %c0_20] : memref<1x1xf32, #tpu.memory_space<vmem>>, vector<1x1xf32>
    %28 = vector.shape_cast %25 : vector<32x16xf32> to vector<2x16x16xf32>
    %29 = vector.shape_cast %26 : vector<1x16xf32> to vector<1x1x16xf32>
    %30 = vector.broadcast %29 : vector<1x1x16xf32> to vector<2x16x16xf32>
    %31 = arith.mulf %28, %30 : vector<2x16x16xf32>
    %cst_21 = arith.constant dense<0.000000e+00> : vector<2x16xf32>
    %32 = vector.multi_reduction <add>, %31, %cst_21 [2] : vector<2x16x16xf32> to vector<2x16xf32>
    %33 = vector.broadcast %27 : vector<1x1xf32> to vector<2x16xf32>
    %34 = arith.addf %32, %33 : vector<2x16xf32>
    %c0_22 = arith.constant 0 : index
    %c0_23 = arith.constant 0 : index
    %35 = vector.load %arg8[%c0_22, %c0_23] : memref<2x16xf32, #tpu.memory_space<vmem>>, vector<2x16xf32>
    tpu.vector_store %arg8[%c0_22, %c0_23], %34 {strides = array<i32>} : memref<2x16xf32, #tpu.memory_space<vmem>>, vector<2x16xf32>,
    return
  }
  func.func @transform_0(%arg0: i32) -> (i32, i32, i32) {
    %c0_i32 = arith.constant 0 : i32
    %c0_i32_0 = arith.constant 0 : i32
    %c0_i32_1 = arith.constant 0 : i32
    return %arg0, %c0_i32, %c0_i32_0 : i32, i32, i32
  }
  func.func @transform_1(%arg0: i32) -> (i32, i32) {
    %c0_i32 = arith.constant 0 : i32
    %c0_i32_0 = arith.constant 0 : i32
    %c0_i32_1 = arith.constant 0 : i32
    return %c0_i32, %c0_i32_0 : i32, i32
  }
  func.func @transform_2(%arg0: i32) -> (i32, i32) {
    %c0_i32 = arith.constant 0 : i32
    %c0_i32_0 = arith.constant 0 : i32
    %c0_i32_1 = arith.constant 0 : i32
    return %c0_i32, %c0_i32_0 : i32, i32
  }
  func.func @transform_3(%arg0: i32) -> (i32, i32) {
    %c0_i32 = arith.constant 0 : i32
    %c0_i32_0 = arith.constant 0 : i32
    %c0_i32_1 = arith.constant 0 : i32
    return %c0_i32, %c0_i32_0 : i32, i32
  }
  func.func @transform_4(%arg0: i32) -> (i32, i32) {
    %c0_i32 = arith.constant 0 : i32
    %c0_i32_0 = arith.constant 0 : i32
    %c0_i32_1 = arith.constant 0 : i32
    return %c0_i32, %c0_i32_0 : i32, i32
  }
  func.func @transform_5(%arg0: i32) -> (i32, i32) {
    %c0_i32 = arith.constant 0 : i32
    %c0_i32_0 = arith.constant 0 : i32
    %c0_i32_1 = arith.constant 0 : i32
    return %c0_i32, %c0_i32_0 : i32, i32
  }
  func.func @transform_6(%arg0: i32) -> (i32, i32) {
    %c0_i32 = arith.constant 0 : i32
    %c0_i32_0 = arith.constant 0 : i32
    %c0_i32_1 = arith.constant 0 : i32
    return %c0_i32, %c0_i32_0 : i32, i32
  }
  func.func @transform_7(%arg0: i32) -> (i32, i32) {
    %c0_i32 = arith.constant 0 : i32
    %c0_i32_0 = arith.constant 0 : i32
    return %arg0, %c0_i32 : i32, i32
  }
}

</mosaic_0001>

<bundles_post_ra>
// kernel: tpu_custom_call.1
= control target key start
LH: loop header
LB: loop body
LE: loop exit
PB: predicated region body
PF: predicated region fallthrough
CT: control target
= control target key end

     0   :  { %s694_s0 = inlined_call_operand.vmem [shape: f32[2,16,32], index: 0, kind: input, shape index: {}]   ;;  %s695_s1 = inlined_call_operand.vmem [shape: f32[32,32], index: 1, kind: input, shape index: {}]   ;;  %s696_s2 = inlined_call_operand.vmem [shape: f32[32,16], index: 2, kind: input, shape index: {}]   ;;  %s697_s3 = inlined_call_operand.vmem [shape: f32[32,16], index: 3, kind: input, shape index: {}]   ;;  %s698_s4 = inlined_call_operand.vmem [shape: f32[1,16], index: 4, kind: input, shape index: {}]   ;;  %s699_s5 = inlined_call_operand.vmem [shape: f32[1,16], index: 5, kind: input, shape index: {}]   ;;  %s700_s6 = inlined_call_operand.<no memory space> [shape: f32[1,1], index: 6, kind: input, shape index: {}]   ;;  %s701_s7 = inlined_call_operand.hbm [shape: f32[2,16], index: 7, kind: output, shape index: {}]  }
   0x1   :  { %v12_v0 = vstv %s700_s6 }
   0x2   :  { %13 = vst [vmem:[#allocation2] sm:$0x1] %v12_v0 }
   0x3   :  { %v54_v1 = vld [vmem:[%s695_s1] sm:$0xff]  ;;  %v55_v2 = vld [vmem:[%s695_s1 + $0x8] sm:$0xff]  ;;  %v56_v3 = vld [vmem:[%s695_s1 + $0x10] sm:$0xff]  ;;  %v565_v4 = vmov 0.0|0.0   ;;  %vm566_vm0 = vmmov 0   ;;  %v567_v7 = vmov 0.0  }
   0x4   :  { %514 = vmatprep.subr.bf16.mxu1 %v565_v4  ;;  %v515_v5 = vpack.c.bf16 %v55_v2, %v54_v1  ;;  %v57_v6 = vld [vmem:[%s695_s1 + $0x18] sm:$0xff]  ;;  %486 = vmatprep.mubr.msk.f32.mxu1 %vm566_vm0, %v567_v7  ;;  %v29_v8 = vld [vmem:[%s694_s0] sm:$0xff]  ;;  %v30_v9 = vld [vmem:[%s694_s0 + $0x8] sm:$0xff]  ;;  %vm33_vm1 = vcmask 261120  }
   0x5   :  { %v31_v10 = vld [vmem:[%s694_s0 + $0x10] sm:$0xff]  ;;  %v32_v11 = vld [vmem:[%s694_s0 + $0x18] sm:$0xff]  ;;  %v34_v12 = vsel %vm33_vm1, %v29_v8, 0.0  ;;  %v35_v13 = vsel %vm33_vm1, %v30_v9, 0.0  ;;  %v518_v14 = vpack.c.bf16 %v57_v6, %v56_v3  ;;  %v143_v18 = vld [vmem:[%s697_s3] sm:$0xff] }
   0x6   :  { %516 = vmatpush3.bf16.msra.mxu1 %v515_v5  ;;  %v36_v15 = vadd.f32 %v35_v13, %v34_v12  ;;  %v43_v16 = vsel %vm33_vm1, %v31_v10, 0.0  ;;  %v44_v17 = vsel %vm33_vm1, %v32_v11, 0.0  ;;  %v144_v19 = vld [vmem:[%s697_s3 + $0x8] sm:$0xff] }
   0x7   :  { %517 = vmatprep.subr.bf16.mxu1 %v565_v4  ;;  %v45_v20 = vadd.f32 %v44_v17, %v43_v16  ;;  %v526_v21 = vpack.c.bf16 %v144_v19, %v143_v18 }
   0x8   :  { %14 = vsyncpa [#allocation4], 0  ;;  %v37_v22 = vrot.slane %v36_v15, 4  ;;  %v139_v33 = vld [vmem:[%s696_s2] sm:$0xff]  ;;  %v140_v34 = vld [vmem:[%s696_s2 + $0x8] sm:$0xff]  ;;  %vm60_vm2 = vcmask 1041409   ;;  %v322_v60 = vlaneseq }
   0x9   :  { %v46_v23 = vrot.slane %v45_v20, 4  ;;  %527 = vmatprep.subr.bf16.mxu0 %v526_v21  ;;  %v521_v38 = vpack.c.bf16 %v140_v34, %v139_v33  ;;  %v141_v40 = vld [vmem:[%s696_s2 + $0x10] sm:$0xff]  ;;  %v142_v41 = vld [vmem:[%s696_s2 + $0x18] sm:$0xff]  ;;  %v135_v46 = vmax.f32 %v29_v8, 0.0  ;;  %v136_v47 = vmax.f32 %v30_v9, 0.0 }
   0xa   :  { %519 = vmatpush3.bf16.msra.mxu1 %v518_v14  ;;  %v38_v24 = vadd.f32 %v37_v22, %v36_v15  ;;  %529 = vmatpush3.bf16.msra.mxu0 %v526_v21  ;;  %v524_v42 = vpack.c.bf16 %v142_v41, %v141_v40  ;;  %v145_v43 = vld [vmem:[%s697_s3 + $0x10] sm:$0xff]  ;;  %v146_v44 = vld [vmem:[%s697_s3 + $0x18] sm:$0xff]  ;;  %v137_v48 = vmax.f32 %v31_v10, 0.0  ;;  %v138_v49 = vmax.f32 %v32_v11, 0.0  ;;  %v457_v8 = vld [vmem:[%s698_s4] ss:$0 sm:$0xff] }
   0xb   :  { %v47_v25 = vadd.f32 %v46_v23, %v45_v20  ;;  %520 = vmatprep.subr.bf16.mxu1 %v565_v4  ;;  %v530_v45 = vpack.c.bf16 %v146_v44, %v145_v43  ;;  %508 = vmatprep.mubr.msk.f32.mxu0 %vm33_vm1, %v135_v46  ;;  %v568_v57 = vmov 0   ;;  %v569_v58 = vmov 1966171168   ;;  %v458_v16 = vld [vmem:[%s699_s5] ss:$0 sm:$0xff]  ;;  %s570_s4 = smov [#allocation3]  }
   0xc   :  { %v39_v26 = vrot.slane %v38_v24, 2  ;;  %540 = vset.pattern.permute.xlu0 %v568_v57  ;;  %v320_v59 = vunpack.c.l.s4 %v569_v58  ;;  %v323_v62 = vshrl.u32 %v322_v60, 7  ;;  %vm381_vm3 = vcmask 130048   ;;  %s443_s5 = sshll.u32 %s570_s4, 4  ;;  %s444_s5 = int_to_ptr.vmem [resolvable:$true] %s443_s5 }
   0xd   :  { %v48_v27 = vrot.slane %v47_v25, 2  ;;  %531 = vmatprep.subr.bf16.mxu0 %v530_v45  ;;  %v412_v33 = vand.u32 127, %v322_v60  ;;  %vm422_vm4 = vcmask 130112   ;;  %vm435_vm5 = vcmask 123904   ;;  %s541_s6 = scalar_lea.vmem %s444_s5, 32  ;;  %p546_p1 = scmp.lt.s32.totalorder %s444_s5, %s444_s5 }
   0xe   :  { %v40_v28 = vadd.f32 %v39_v26, %v38_v24  ;;  %533 = vmatpush3.bf16.msra.mxu0 %v530_v45  ;;  %v321_v61 = vunpack.c.0.s8 %v320_v59  ;;  %v343_v3 = vsub.s32 0, %v323_v62  ;;  %p542_p0 = scmp.ne.s32.totalorder %s444_s5, %s541_s6  ;;  %p547_p2 = scmp.lt.s32.totalorder %s541_s6, %s541_s6 }
   0xf   :  { %v49_v29 = vadd.f32 %v48_v27, %v47_v25 }
  0x10   :  { %v41_v30 = vrot.slane %v40_v28, 1  ;;  %v324_v63 = vsub.s32 %v321_v61, %v323_v62  ;;  %p548_p3 = por %p547_p2, %p546_p1 }
  0x11   :  { %v50_v31 = vrot.slane %v49_v29, 1  ;;  %509 = vmatmul.mubr.msk.f32.vlgmr.msra.gmra.mrb[0].mxu0 %vm33_vm1, %v136_v47 }
  0x12   :  { %v42_v32 = vadd.f32 %v41_v30, %v40_v28  ;;  %511 = vmatprep.mubr.msk.f32.mxu0 %vm33_vm1, %v137_v48  ;;  %p549_p4 = pnand %p548_p3, %p542_p0 }
  0x13   :  { %v51_v35 = vadd.f32 %v50_v31, %v49_v29  ;;  %v459_v31 = vld [vmem:[#allocation2] ss:$0 sm:$0xff] }
  0x14   :  { %v52_v36 = vmul.f32 0.0625, %v42_v32 }
  0x15   :  { %v53_v37 = vmul.f32 0.0625, %v51_v35  ;;  %512 = vmatmul.mubr.msk.f32.gmra.mrb[2].mxu0 %vm33_vm1, %v138_v49  ;;  %v417_v35 = vadd.s32 4294967288, %v412_v33 }
  0x17   :  { %v61_v39 = vsel %vm60_vm2, %v53_v37, %v52_v36  ;;  %v415_v37 = vsub.s32 %v412_v33, %v323_v62 }
  0x18   :  { %487 = vmatmul.mubr.msk.f32.vlgmr.msra.gmra.mrb[0].mxu1 %vm33_vm1, %v61_v39 }
  0x19   :  { %522 = vmatpush3.bf16.msra.mxu1 %v521_v38  ;;  %497 = vmatprep.mubr.msk.f32.mxu1 %vm566_vm0, %v567_v7  ;;  %v420_v38 = vsub.s32 %v417_v35, %v323_v62 }
  0x1a   :  { %523 = vmatprep.subr.bf16.mxu1 %v565_v4 }
  0x1d   :  { %525 = vmatpush3.bf16.msra.mxu1 %v524_v42 }
  0xe4   :  { %v510_v53 = vpop.f32.mrb[0].mxu0 }
  0xe5   :  { %v299_v54 = vpop.f32.mrb[1].mxu0 }
  0xe8   :  { %v513_v55 = vpop.f32.mrb[2].mxu0 }
  0xe9   :  { %v309_v56 = vpop.f32.mrb[3].mxu0 }
  0xeb   :  { %v130_v50 = vpop.f32.mrb[0].mxu1 }
  0xec   :  { %v134_v51 = vmax.f32 %v130_v50, 0.0  ;;  %v488_v52 = vpop.f32.mrb[1].mxu1 }
  0xee   :  { %498 = vmatmul.mubr.msk.f32.vlgmr.msra.gmra.mrb[2].mxu1 %vm33_vm1, %v134_v51 }
 0x1c1   :  { %v217_v0 = vpop.f32.mrb[2].mxu1 }
 0x1c2   :  { %v325_v1 = vrot.slane %v217_v0, %v324_v63  ;;  %v499_v2 = vpop.f32.mrb[3].mxu1 }
 0x1c4   :  { %v326_v4 = vcombine.high %v325_v1, %v325_v1  ;;  %v333_v5 = vrot.slane %v325_v1, %v324_v63 }
 0x1c6   :  { %v344_v6 = vrot.slane %v333_v5, %v343_v3  ;;  %v340_v7 = vrot.slane %v326_v4, %v324_v63 }
 0x1c8   :  { %v352_v9 = vadd.f32 %v510_v53, %v344_v6  ;;  %v351_v10 = vadd.f32 %v344_v6, %v299_v54  ;;  %v348_v11 = vrot.slane %v340_v7, %v343_v3 }
 0x1ca   :  { %v362_v12 = vadd.f32 %v457_v8, %v352_v9  ;;  %v361_v13 = vadd.f32 %v457_v8, %v351_v10  ;;  %v354_v14 = vadd.f32 %v513_v55, %v348_v11  ;;  %v353_v15 = vadd.f32 %v348_v11, %v309_v56 }
 0x1cc   :  { %v366_v17 = vmax.f32 %v362_v12, 0.0  ;;  %v365_v18 = vmax.f32 %v361_v13, 0.0  ;;  %v364_v19 = vadd.f32 %v457_v8, %v354_v14  ;;  %v363_v20 = vadd.f32 %v457_v8, %v353_v15 }
 0x1ce   :  { %v368_v21 = vmax.f32 %v364_v19, 0.0  ;;  %v367_v22 = vmax.f32 %v363_v20, 0.0  ;;  %v377_v23 = vmul.f32 %v458_v16, %v365_v18  ;;  %v378_v26 = vmul.f32 %v458_v16, %v366_v17 }
 0x1d0   :  { %v382_v24 = vsel %vm381_vm3, %v377_v23, 0.0  ;;  %v379_v25 = vmul.f32 %v458_v16, %v367_v22  ;;  %v380_v28 = vmul.f32 %v458_v16, %v368_v21  ;;  %v385_v29 = vsel %vm381_vm3, %v378_v26, 0.0 }
 0x1d1   :  { %383 = vadd.xlane.f32.xlu0 %v382_v24 }
 0x1d2   :  { %v388_v27 = vsel %vm381_vm3, %v379_v25, 0.0  ;;  %v391_v30 = vsel %vm381_vm3, %v380_v28, 0.0 }
 0x1d3   :  { %389 = vadd.xlane.f32.xlu1 %v388_v27 }
 0x1d5   :  { %386 = vadd.xlane.f32.xlu0 %v385_v29 }
 0x1d7   :  { %392 = vadd.xlane.f32.xlu1 %v391_v30 }
 0x1eb   :  { %400 = vperm.xlu0 %540, %v459_v31  }
 0x25e   :  { %v384_v32 = vpop.xlane.xlu0 %383 }
 0x260   :  { %v390_v34 = vpop.xlane.xlu1 %389 }
 0x262   :  { %v387_v36 = vpop.xlane.xlu0 %386 }
 0x264   :  { %v393_v39 = vpop.xlane.xlu1 %392 }
 0x26a   :  { %v401_v40 = vpop.permute.xlu0 %400 }
 0x26b   :  { %v403_v41 = vadd.f32 %v401_v40, %v384_v32  ;;  %v404_v42 = vadd.f32 %v401_v40, %v387_v36  ;;  %v405_v43 = vadd.f32 %v401_v40, %v390_v34  ;;  %v406_v44 = vadd.f32 %v401_v40, %v393_v39 }
 0x26d   :  { %v416_v45 = vrot.slane %v403_v41, %v415_v37  ;;  %v421_v46 = vrot.slane %v404_v42, %v420_v38  ;;  %v427_v47 = vrot.slane %v405_v43, %v415_v37  ;;  %v431_v48 = vrot.slane %v406_v44, %v420_v38 }
 0x26f   :  { %v423_v49 = vsel %vm422_vm4, %v421_v46, %v416_v45  ;;  %v432_v50 = vsel %vm422_vm4, %v431_v48, %v427_v47 }
 0x270   :  { %v433_v51 = vsel %vm60_vm2, %v432_v50, %v423_v49 }
 0x271   :  { %436 = vst.msk [vmem:[#allocation3] sm:$0x3] %vm435_vm5, %v433_v51 }
 0x272   :  { %552 = shalt.err (!%p549_p4)
}
 0x273   :  { %s553_s13 = scalar_lea.hbm %s701_s7, 32 }
 0x274   :  { %p554_p5 = scmp.ne.s32.totalorder %s701_s7, %s553_s13  ;;  %p557_p6 = scmp.lt.u32.totalorder %s553_s13, %s701_s7 }
 0x276   :  { %p559_p7 = pnand %p557_p6, %p554_p5 }
 0x278   :  { %562 = shalt.err (!%p559_p7)
}
 0x279   :  { %446 = dma.vmem_to_hbm [thread:$0]  %s444_s5, 32, %s701_s7, [#allocation4]  }
 0x27a   :  { %563 = dma.done.wait [#allocation4], 32  }
 0x27b   :  { %564 = vsyncadd [#allocation4], 4294967264 }
 0x27c   :  { %450 = vsyncpa [#allocation4], 1 }

// kernel: tpu_custom_call.1
= control target key start
LH: loop header
LB: loop body
LE: loop exit
PB: predicated region body
PF: predicated region fallthrough
CT: control target
= control target key end

     0   :  { %s694_s0 = inlined_call_operand.vmem [shape: f32[2,16,32], index: 0, kind: input, shape index: {}]   ;;  %s695_s1 = inlined_call_operand.vmem [shape: f32[32,32], index: 1, kind: input, shape index: {}]   ;;  %s696_s2 = inlined_call_operand.vmem [shape: f32[32,16], index: 2, kind: input, shape index: {}]   ;;  %s697_s3 = inlined_call_operand.vmem [shape: f32[32,16], index: 3, kind: input, shape index: {}]   ;;  %s698_s4 = inlined_call_operand.vmem [shape: f32[1,16], index: 4, kind: input, shape index: {}]   ;;  %s699_s5 = inlined_call_operand.vmem [shape: f32[1,16], index: 5, kind: input, shape index: {}]   ;;  %s700_s6 = inlined_call_operand.<no memory space> [shape: f32[1,1], index: 6, kind: input, shape index: {}]   ;;  %s701_s7 = inlined_call_operand.hbm [shape: f32[2,16], index: 7, kind: output, shape index: {}]  }
   0x1   :  { %v12_v0 = vstv %s700_s6 }
   0x2   :  { %13 = vst [vmem:[#allocation2] sm:$0x1] %v12_v0 }
   0x3   :  { %v54_v1 = vld [vmem:[%s695_s1] sm:$0xff]  ;;  %v55_v2 = vld [vmem:[%s695_s1 + $0x8] sm:$0xff]  ;;  %v56_v3 = vld [vmem:[%s695_s1 + $0x10] sm:$0xff]  ;;  %v565_v4 = vmov 0.0|0.0   ;;  %vm566_vm0 = vmmov 0   ;;  %v567_v7 = vmov 0.0  }
   0x4   :  { %514 = vmatprep.subr.bf16.mxu1 %v565_v4  ;;  %v515_v5 = vpack.c.bf16 %v55_v2, %v54_v1  ;;  %v57_v6 = vld [vmem:[%s695_s1 + $0x18] sm:$0xff]  ;;  %486 = vmatprep.mubr.msk.f32.mxu1 %vm566_vm0, %v567_v7  ;;  %v29_v8 = vld [vmem:[%s694_s0] sm:$0xff]  ;;  %v30_v9 = vld [vmem:[%s694_s0 + $0x8] sm:$0xff]  ;;  %vm33_vm1 = vcmask 261120  }
   0x5   :  { %v31_v10 = vld [vmem:[%s694_s0 + $0x10] sm:$0xff]  ;;  %v32_v11 = vld [vmem:[%s694_s0 + $0x18] sm:$0xff]  ;;  %v34_v12 = vsel %vm33_vm1, %v29_v8, 0.0  ;;  %v35_v13 = vsel %vm33_vm1, %v30_v9, 0.0  ;;  %v518_v14 = vpack.c.bf16 %v57_v6, %v56_v3  ;;  %v143_v18 = vld [vmem:[%s697_s3] sm:$0xff] }
   0x6   :  { %516 = vmatpush3.bf16.msra.mxu1 %v515_v5  ;;  %v36_v15 = vadd.f32 %v35_v13, %v34_v12  ;;  %v43_v16 = vsel %vm33_vm1, %v31_v10, 0.0  ;;  %v44_v17 = vsel %vm33_vm1, %v32_v11, 0.0  ;;  %v144_v19 = vld [vmem:[%s697_s3 + $0x8] sm:$0xff] }
   0x7   :  { %517 = vmatprep.subr.bf16.mxu1 %v565_v4  ;;  %v45_v20 = vadd.f32 %v44_v17, %v43_v16  ;;  %v526_v21 = vpack.c.bf16 %v144_v19, %v143_v18 }
   0x8   :  { %14 = vsyncpa [#allocation4], 0  ;;  %v37_v22 = vrot.slane %v36_v15, 4  ;;  %v139_v33 = vld [vmem:[%s696_s2] sm:$0xff]  ;;  %v140_v34 = vld [vmem:[%s696_s2 + $0x8] sm:$0xff]  ;;  %vm60_vm2 = vcmask 1041409   ;;  %v322_v60 = vlaneseq }
   0x9   :  { %v46_v23 = vrot.slane %v45_v20, 4  ;;  %527 = vmatprep.subr.bf16.mxu0 %v526_v21  ;;  %v521_v38 = vpack.c.bf16 %v140_v34, %v139_v33  ;;  %v141_v40 = vld [vmem:[%s696_s2 + $0x10] sm:$0xff]  ;;  %v142_v41 = vld [vmem:[%s696_s2 + $0x18] sm:$0xff]  ;;  %v135_v46 = vmax.f32 %v29_v8, 0.0  ;;  %v136_v47 = vmax.f32 %v30_v9, 0.0 }
   0xa   :  { %519 = vmatpush3.bf16.msra.mxu1 %v518_v14  ;;  %v38_v24 = vadd.f32 %v37_v22, %v36_v15  ;;  %529 = vmatpush3.bf16.msra.mxu0 %v526_v21  ;;  %v524_v42 = vpack.c.bf16 %v142_v41, %v141_v40  ;;  %v145_v43 = vld [vmem:[%s697_s3 + $0x10] sm:$0xff]  ;;  %v146_v44 = vld [vmem:[%s697_s3 + $0x18] sm:$0xff]  ;;  %v137_v48 = vmax.f32 %v31_v10, 0.0  ;;  %v138_v49 = vmax.f32 %v32_v11, 0.0  ;;  %v457_v8 = vld [vmem:[%s698_s4] ss:$0 sm:$0xff] }
   0xb   :  { %v47_v25 = vadd.f32 %v46_v23, %v45_v20  ;;  %520 = vmatprep.subr.bf16.mxu1 %v565_v4  ;;  %v530_v45 = vpack.c.bf16 %v146_v44, %v145_v43  ;;  %508 = vmatprep.mubr.msk.f32.mxu0 %vm33_vm1, %v135_v46  ;;  %v568_v57 = vmov 0   ;;  %v569_v58 = vmov 1966171168   ;;  %v458_v16 = vld [vmem:[%s699_s5] ss:$0 sm:$0xff]  ;;  %s570_s4 = smov [#allocation3]  }
   0xc   :  { %v39_v26 = vrot.slane %v38_v24, 2  ;;  %540 = vset.pattern.permute.xlu0 %v568_v57  ;;  %v320_v59 = vunpack.c.l.s4 %v569_v58  ;;  %v323_v62 = vshrl.u32 %v322_v60, 7  ;;  %vm381_vm3 = vcmask 130048   ;;  %s443_s5 = sshll.u32 %s570_s4, 4  ;;  %s444_s5 = int_to_ptr.vmem [resolvable:$true] %s443_s5 }
   0xd   :  { %v48_v27 = vrot.slane %v47_v25, 2  ;;  %531 = vmatprep.subr.bf16.mxu0 %v530_v45  ;;  %v412_v33 = vand.u32 127, %v322_v60  ;;  %vm422_vm4 = vcmask 130112   ;;  %vm435_vm5 = vcmask 123904   ;;  %s541_s6 = scalar_lea.vmem %s444_s5, 32  ;;  %p546_p1 = scmp.lt.s32.totalorder %s444_s5, %s444_s5 }
   0xe   :  { %v40_v28 = vadd.f32 %v39_v26, %v38_v24  ;;  %533 = vmatpush3.bf16.msra.mxu0 %v530_v45  ;;  %v321_v61 = vunpack.c.0.s8 %v320_v59  ;;  %v343_v3 = vsub.s32 0, %v323_v62  ;;  %p542_p0 = scmp.ne.s32.totalorder %s444_s5, %s541_s6  ;;  %p547_p2 = scmp.lt.s32.totalorder %s541_s6, %s541_s6 }
   0xf   :  { %v49_v29 = vadd.f32 %v48_v27, %v47_v25 }
  0x10   :  { %v41_v30 = vrot.slane %v40_v28, 1  ;;  %v324_v63 = vsub.s32 %v321_v61, %v323_v62  ;;  %p548_p3 = por %p547_p2, %p546_p1 }
  0x11   :  { %v50_v31 = vrot.slane %v49_v29, 1  ;;  %509 = vmatmul.mubr.msk.f32.vlgmr.msra.gmra.mrb[0].mxu0 %vm33_vm1, %v136_v47 }
  0x12   :  { %v42_v32 = vadd.f32 %v41_v30, %v40_v28  ;;  %511 = vmatprep.mubr.msk.f32.mxu0 %vm33_vm1, %v137_v48  ;;  %p549_p4 = pnand %p548_p3, %p542_p0 }
  0x13   :  { %v51_v35 = vadd.f32 %v50_v31, %v49_v29  ;;  %v459_v31 = vld [vmem:[#allocation2] ss:$0 sm:$0xff] }
  0x14   :  { %v52_v36 = vmul.f32 0.0625, %v42_v32 }
  0x15   :  { %v53_v37 = vmul.f32 0.0625, %v51_v35  ;;  %512 = vmatmul.mubr.msk.f32.gmra.mrb[2].mxu0 %vm33_vm1, %v138_v49  ;;  %v417_v35 = vadd.s32 4294967288, %v412_v33 }
  0x17   :  { %v61_v39 = vsel %vm60_vm2, %v53_v37, %v52_v36  ;;  %v415_v37 = vsub.s32 %v412_v33, %v323_v62 }
  0x18   :  { %487 = vmatmul.mubr.msk.f32.vlgmr.msra.gmra.mrb[0].mxu1 %vm33_vm1, %v61_v39 }
  0x19   :  { %522 = vmatpush3.bf16.msra.mxu1 %v521_v38  ;;  %497 = vmatprep.mubr.msk.f32.mxu1 %vm566_vm0, %v567_v7  ;;  %v420_v38 = vsub.s32 %v417_v35, %v323_v62 }
  0x1a   :  { %523 = vmatprep.subr.bf16.mxu1 %v565_v4 }
  0x1d   :  { %525 = vmatpush3.bf16.msra.mxu1 %v524_v42 }
  0xe4   :  { %v510_v53 = vpop.f32.mrb[0].mxu0 }
  0xe5   :  { %v299_v54 = vpop.f32.mrb[1].mxu0 }
  0xe8   :  { %v513_v55 = vpop.f32.mrb[2].mxu0 }
  0xe9   :  { %v309_v56 = vpop.f32.mrb[3].mxu0 }
  0xeb   :  { %v130_v50 = vpop.f32.mrb[0].mxu1 }
  0xec   :  { %v134_v51 = vmax.f32 %v130_v50, 0.0  ;;  %v488_v52 = vpop.f32.mrb[1].mxu1 }
  0xee   :  { %498 = vmatmul.mubr.msk.f32.vlgmr.msra.gmra.mrb[2].mxu1 %vm33_vm1, %v134_v51 }
 0x1c1   :  { %v217_v0 = vpop.f32.mrb[2].mxu1 }
 0x1c2   :  { %v325_v1 = vrot.slane %v217_v0, %v324_v63  ;;  %v499_v2 = vpop.f32.mrb[3].mxu1 }
 0x1c4   :  { %v326_v4 = vcombine.high %v325_v1, %v325_v1  ;;  %v333_v5 = vrot.slane %v325_v1, %v324_v63 }
 0x1c6   :  { %v344_v6 = vrot.slane %v333_v5, %v343_v3  ;;  %v340_v7 = vrot.slane %v326_v4, %v324_v63 }
 0x1c8   :  { %v352_v9 = vadd.f32 %v510_v53, %v344_v6  ;;  %v351_v10 = vadd.f32 %v344_v6, %v299_v54  ;;  %v348_v11 = vrot.slane %v340_v7, %v343_v3 }
 0x1ca   :  { %v362_v12 = vadd.f32 %v457_v8, %v352_v9  ;;  %v361_v13 = vadd.f32 %v457_v8, %v351_v10  ;;  %v354_v14 = vadd.f32 %v513_v55, %v348_v11  ;;  %v353_v15 = vadd.f32 %v348_v11, %v309_v56 }
 0x1cc   :  { %v366_v17 = vmax.f32 %v362_v12, 0.0  ;;  %v365_v18 = vmax.f32 %v361_v13, 0.0  ;;  %v364_v19 = vadd.f32 %v457_v8, %v354_v14  ;;  %v363_v20 = vadd.f32 %v457_v8, %v353_v15 }
 0x1ce   :  { %v368_v21 = vmax.f32 %v364_v19, 0.0  ;;  %v367_v22 = vmax.f32 %v363_v20, 0.0  ;;  %v377_v23 = vmul.f32 %v458_v16, %v365_v18  ;;  %v378_v26 = vmul.f32 %v458_v16, %v366_v17 }
 0x1d0   :  { %v382_v24 = vsel %vm381_vm3, %v377_v23, 0.0  ;;  %v379_v25 = vmul.f32 %v458_v16, %v367_v22  ;;  %v380_v28 = vmul.f32 %v458_v16, %v368_v21  ;;  %v385_v29 = vsel %vm381_vm3, %v378_v26, 0.0 }
 0x1d1   :  { %383 = vadd.xlane.f32.xlu0 %v382_v24 }
 0x1d2   :  { %v388_v27 = vsel %vm381_vm3, %v379_v25, 0.0  ;;  %v391_v30 = vsel %vm381_vm3, %v380_v28, 0.0 }
 0x1d3   :  { %389 = vadd.xlane.f32.xlu1 %v388_v27 }
 0x1d5   :  { %386 = vadd.xlane.f32.xlu0 %v385_v29 }
 0x1d7   :  { %392 = vadd.xlane.f32.xlu1 %v391_v30 }
 0x1eb   :  { %400 = vperm.xlu0 %540, %v459_v31  }
 0x25e   :  { %v384_v32 = vpop.xlane.xlu0 %383 }
 0x260   :  { %v390_v34 = vpop.xlane.xlu1 %389 }
 0x262   :  { %v387_v36 = vpop.xlane.xlu0 %386 }
 0x264   :  { %v393_v39 = vpop.xlane.xlu1 %392 }
 0x26a   :  { %v401_v40 = vpop.permute.xlu0 %400 }
 0x26b   :  { %v403_v41 = vadd.f32 %v401_v40, %v384_v32  ;;  %v404_v42 = vadd.f32 %v401_v40, %v387_v36  ;;  %v405_v43 = vadd.f32 %v401_v40, %v390_v34  ;;  %v406_v44 = vadd.f32 %v401_v40, %v393_v39 }
 0x26d   :  { %v416_v45 = vrot.slane %v403_v41, %v415_v37  ;;  %v421_v46 = vrot.slane %v404_v42, %v420_v38  ;;  %v427_v47 = vrot.slane %v405_v43, %v415_v37  ;;  %v431_v48 = vrot.slane %v406_v44, %v420_v38 }
 0x26f   :  { %v423_v49 = vsel %vm422_vm4, %v421_v46, %v416_v45  ;;  %v432_v50 = vsel %vm422_vm4, %v431_v48, %v427_v47 }
 0x270   :  { %v433_v51 = vsel %vm60_vm2, %v432_v50, %v423_v49 }
 0x271   :  { %436 = vst.msk [vmem:[#allocation3] sm:$0x3] %vm435_vm5, %v433_v51 }
 0x272   :  { %552 = shalt.err (!%p549_p4)
}
 0x273   :  { %s553_s13 = scalar_lea.hbm %s701_s7, 32 }
 0x274   :  { %p554_p5 = scmp.ne.s32.totalorder %s701_s7, %s553_s13  ;;  %p557_p6 = scmp.lt.u32.totalorder %s553_s13, %s701_s7 }
 0x276   :  { %p559_p7 = pnand %p557_p6, %p554_p5 }
 0x278   :  { %562 = shalt.err (!%p559_p7)
}
 0x279   :  { %446 = dma.vmem_to_hbm [thread:$0]  %s444_s5, 32, %s701_s7, [#allocation4]  }
 0x27a   :  { %563 = dma.done.wait [#allocation4], 32  }
 0x27b   :  { %564 = vsyncadd [#allocation4], 4294967264 }
 0x27c   :  { %450 = vsyncpa [#allocation4], 1 }

</bundles_post_ra>
